<compile_context>
chip_gen: v6e
topology: v6e:2x2x1
jax: 0.10.0
libtpu: 0.0.40
codegen_flags: <defaults>
</compile_context>

<pallas_src>
import functools

import jax
import jax.numpy as jnp
from jax.experimental import pallas as pl
from jax.experimental.pallas import tpu as pltpu


# ---------------------------------------------------------------------------
# tiling helper: lane-dense spatial tiles bounded by a per-block VMEM budget
# ---------------------------------------------------------------------------
def _spatial_tile(hw, c, bytes_per_elem=4, block_budget=2 * 1024 * 1024):
    if hw % 128 != 0:
        return hw  # full (legal: block == full dim); small / ragged maps
    max_ts = max(128, (block_budget // (max(c, 1) * bytes_per_elem)) // 128 * 128)
    ts = min(hw, max_ts)
    while hw % ts != 0:
        ts -= 128
    return ts


# ---------------------------------------------------------------------------
# Kernel 1: CAM pooling -- spatial max & sum per channel (accumulate in output)
# ---------------------------------------------------------------------------
def _pool_kernel(x_ref, pmax_ref, psum_ref):
    t = pl.program_id(1)
    xb = x_ref[0]                                    # (C, ts)
    bmax = jnp.max(xb, axis=-1, keepdims=True)       # (C, 1)  lane reduce (XLU)
    bsum = jnp.sum(xb, axis=-1, keepdims=True)

    @pl.when(t == 0)
    def _():
        pmax_ref[0] = bmax
        psum_ref[0] = bsum

    @pl.when(t > 0)
    def _():
        pmax_ref[0] = jnp.maximum(pmax_ref[0], bmax)
        psum_ref[0] = psum_ref[0] + bsum


# ---------------------------------------------------------------------------
# Kernel 2: CAM shared MLP on (max, avg) + combine + sigmoid   (tiny matmuls)
# ---------------------------------------------------------------------------
def _cam_mlp_kernel(pmax_ref, psum_ref, w1_ref, b1_ref, w2_ref, b2_ref,
                    att_ref, *, inv_hw):
    def mlp(v):
        h = jnp.dot(v, w1_ref[...], preferred_element_type=jnp.float32) + b1_ref[...]
        h = jnp.maximum(h, 0.0)
        return jnp.dot(h, w2_ref[...], preferred_element_type=jnp.float32) + b2_ref[...]

    pmax = pmax_ref[...]                 # (N, C)
    pavg = psum_ref[...] * inv_hw        # spatial mean
    att_ref[...] = jax.nn.sigmoid(mlp(pmax) + mlp(pavg))


# ---------------------------------------------------------------------------
# Kernel 3: SAM channel stats of the attended map (y = att*x kept in VMEM only)
# ---------------------------------------------------------------------------
def _stats_kernel(x_ref, att_ref, st_ref, *, inv_c):
    xb = x_ref[0]                        # (C, ts)
    yb = xb * att_ref[0]                 # (C, ts) * (C, 1); never hits HBM
    cmax = jnp.max(yb, axis=0, keepdims=True)            # (1, ts) sublane reduce
    cavg = jnp.sum(yb, axis=0, keepdims=True) * inv_c
    st_ref[0] = jnp.concatenate([cmax, cavg], axis=0)    # (2, ts)


# ---------------------------------------------------------------------------
# Kernel 4: SAM 7x7 conv (2 -> 1 channel, pad=3, no bias) + sigmoid
#           shifted-window FMAs on the padded 2-channel stat map; weights SMEM
# ---------------------------------------------------------------------------
def _sam_conv_kernel(stp_ref, w_ref, sa_ref, *, H, W):
    mmax = stp_ref[0, 0, :, :]           # (H+6, W+6)
    mavg = stp_ref[0, 1, :, :]
    acc = jnp.zeros((H, W), jnp.float32)
    for ky in range(7):
        for kx in range(7):
            k = ky * 7 + kx
            acc = acc + w_ref[k] * mmax[ky:ky + H, kx:kx + W]
            acc = acc + w_ref[49 + k] * mavg[ky:ky + H, kx:kx + W]
    sa_ref[0] = jax.nn.sigmoid(acc)


# ---------------------------------------------------------------------------
# Kernel 5: final fused gate + residual:
#           out = sa * (att * x) + x  ==  x * (att * sa + 1)
#           (y is recomputed from x and att instead of being read from HBM)
# ---------------------------------------------------------------------------
def _apply_kernel(x_ref, att_ref, sa_ref, o_ref):
    gate = att_ref[0] * sa_ref[0] + 1.0          # (C,1)*(1,ts)+1 -> (C,ts)
    o_ref[0] = x_ref[0] * gate


# ---------------------------------------------------------------------------
# CBAM forward (NCHW in / NCHW out, matching the PyTorch module)
# ---------------------------------------------------------------------------
def cbam_forward(x_nchw, params):
    x4 = x_nchw.astype(jnp.float32)
    N, C, H, W = x4.shape
    HW = H * W
    x = x4.reshape(N, C, HW)                      # free reshape, no transpose
    ts = _spatial_tile(HW, C)
    T = HW // ts

    # ---- CAM: spatial max / sum pooling ---------------------------------
    pmax, psum = pl.pallas_call(
        _pool_kernel,
        grid=(N, T),
        in_specs=[pl.BlockSpec((1, C, ts), lambda n, t: (n, 0, t))],
        out_specs=[pl.BlockSpec((1, C, 1), lambda n, t: (n, 0, 0)),
                   pl.BlockSpec((1, C, 1), lambda n, t: (n, 0, 0))],
        out_shape=[jax.ShapeDtypeStruct((N, C, 1), jnp.float32),
                   jax.ShapeDtypeStruct((N, C, 1), jnp.float32)],
        compiler_params=pltpu.CompilerParams(
            dimension_semantics=("parallel", "arbitrary")),
        cost_estimate=pl.CostEstimate(
            flops=2 * N * HW * C, transcendentals=0,
            bytes_accessed=4 * (N * HW * C + 2 * N * C)),
    )(x)

    # ---- CAM: shared MLP + sigmoid (tiny; single invocation) ------------
    att = pl.pallas_call(
        functools.partial(_cam_mlp_kernel, inv_hw=1.0 / HW),
        out_shape=jax.ShapeDtypeStruct((N, C), jnp.float32),
    )(pmax.reshape(N, C), psum.reshape(N, C),
      params["w1"], params["b1"].reshape(1, -1),
      params["w2"], params["b2"].reshape(1, -1))
    att3 = att.reshape(N, C, 1)

    # ---- SAM channel stats of the attended map (y stays in VMEM) --------
    cstats = pl.pallas_call(
        functools.partial(_stats_kernel, inv_c=1.0 / C),
        grid=(N, T),
        in_specs=[pl.BlockSpec((1, C, ts), lambda n, t: (n, 0, t)),
                  pl.BlockSpec((1, C, 1), lambda n, t: (n, 0, 0))],
        out_specs=pl.BlockSpec((1, 2, ts), lambda n, t: (n, 0, t)),
        out_shape=jax.ShapeDtypeStruct((N, 2, HW), jnp.float32),
        compiler_params=pltpu.CompilerParams(
            dimension_semantics=("parallel", "parallel")),
        cost_estimate=pl.CostEstimate(
            flops=3 * N * HW * C, transcendentals=0,
            bytes_accessed=4 * (N * HW * C + N * C + 2 * N * HW)),
    )(x, att3)

    # ---- SAM 7x7 conv + sigmoid on the tiny 2-channel map ----------------
    Hp, Wp = H + 6, W + 6
    stp = jnp.pad(cstats.reshape(N, 2, H, W), ((0, 0), (0, 0), (3, 3), (3, 3)))
    w_flat = params["w_sam"].reshape(98).astype(jnp.float32)
    sa = pl.pallas_call(
        functools.partial(_sam_conv_kernel, H=H, W=W),
        grid=(N,),
        in_specs=[pl.BlockSpec((1, 2, Hp, Wp), lambda n: (n, 0, 0, 0)),
                  pl.BlockSpec(memory_space=pltpu.MemorySpace.SMEM)],
        out_specs=pl.BlockSpec((1, H, W), lambda n: (n, 0, 0)),
        out_shape=jax.ShapeDtypeStruct((N, H, W), jnp.float32),
        compiler_params=pltpu.CompilerParams(dimension_semantics=("parallel",)),
    )(stp, w_flat)

    # ---- SAM apply + CBAM residual (y recomputed; no extra HBM pass) -----
    out = pl.pallas_call(
        _apply_kernel,
        grid=(N, T),
        in_specs=[pl.BlockSpec((1, C, ts), lambda n, t: (n, 0, t)),
                  pl.BlockSpec((1, C, 1), lambda n, t: (n, 0, 0)),
                  pl.BlockSpec((1, 1, ts), lambda n, t: (n, 0, t))],
        out_specs=pl.BlockSpec((1, C, ts), lambda n, t: (n, 0, t)),
        out_shape=jax.ShapeDtypeStruct((N, C, HW), jnp.float32),
        compiler_params=pltpu.CompilerParams(
            dimension_semantics=("parallel", "parallel")),
        cost_estimate=pl.CostEstimate(
            flops=3 * N * HW * C, transcendentals=0,
            bytes_accessed=4 * (2 * N * HW * C + N * C + N * HW)),
    )(x, att3, sa.reshape(N, 1, HW))

    return out.reshape(N, C, H, W)


# ---------------------------------------------------------------------------
# Parameters (matching CBAM(channels, r): shared MLP + 7x7 conv, no bias on
# the conv)
# ---------------------------------------------------------------------------
def init_params(key, channels, r):
    ch = max(1, channels // r)
    k = jax.random.split(key, 5)
    return {
        "w1": 0.3 * jax.random.normal(k[0], (channels, ch), jnp.float32),
        "b1": 0.1 * jax.random.normal(k[1], (ch,), jnp.float32),
        "w2": 0.3 * jax.random.normal(k[2], (ch, channels), jnp.float32),
        "b2": 0.1 * jax.random.normal(k[3], (channels,), jnp.float32),
        "w_sam": 0.3 * jax.random.normal(k[4], (1, 2, 7, 7), jnp.float32),  # OIHW
    }


# ---------------------------------------------------------------------------
# Pure-JAX reference for correctness checking
# ---------------------------------------------------------------------------
def cbam_reference(x_nchw, params):
    x = x_nchw.astype(jnp.float32)
    # CAM
    pmax = jnp.max(x, axis=(2, 3))               # (N, C)
    pavg = jnp.mean(x, axis=(2, 3))

    def mlp(v):
        h = jax.nn.relu(v @ params["w1"] + params["b1"])
        return h @ params["w2"] + params["b2"]

    att = jax.nn.sigmoid(mlp(pmax) + mlp(pavg))
    y = x * att[:, :, None, None]
    # SAM
    cmax = jnp.max(y, axis=1, keepdims=True)
    cavg = jnp.mean(y, axis=1, keepdims=True)
    cat = jnp.concatenate([cmax, cavg], axis=1)   # (N, 2, H, W)
    sa = jax.lax.conv_general_dilated(
        cat, params["w_sam"], (1, 1), ((3, 3), (3, 3)),
        dimension_numbers=("NCHW", "OIHW", "NCHW"))
    sa = jax.nn.sigmoid(sa)
    return sa * y + x


if __name__ == "__main__":
    key = jax.random.PRNGKey(0)
    k_x, k_p = jax.random.split(key)

    batch, channels, spatial, r = 2, 4, 16, 2
    x = jax.random.normal(k_x, (batch, channels, spatial, spatial), jnp.float32)
    params = init_params(k_p, channels, r)

    out = jax.block_until_ready(cbam_forward(x, params))
    ref = jax.block_until_ready(cbam_reference(x, params))

    assert out.shape == (batch, channels, spatial, spatial), out.shape
    assert jnp.allclose(out, ref, atol=1e-4, rtol=1e-4), \
        float(jnp.max(jnp.abs(out - ref)))

    print("KERNEL_OK")
</pallas_src>

<mosaic_0001>
module attributes {stable_mosaic.version = 11 : i64} {
  func.func @_pool_kernel(%arg0: i32, %arg1: i32, %arg2: memref<1x4x256xf32, #tpu.memory_space<vmem>>, %arg3: memref<1x4x1xf32, #tpu.memory_space<vmem>>, %arg4: memref<1x4x1xf32, #tpu.memory_space<vmem>>) attributes {dimension_semantics = [#tpu.dimension_semantics<parallel>, #tpu.dimension_semantics<arbitrary>], iteration_bounds = array<i64: 2, 1>, scalar_prefetch = 0 : i64, scratch_operands = 0 : i64, tpu.core_type = #tpu.core_type<tc>, window_params = [{transform_indices = @transform_0, window_bounds = array<i64: 1, 4, 256>}, {transform_indices = @transform_1, window_bounds = array<i64: 1, 4, 1>}, {transform_indices = @transform_2, window_bounds = array<i64: 1, 4, 1>}]} {
    %c0 = arith.constant 0 : index
    %c0_0 = arith.constant 0 : index
    %c0_1 = arith.constant 0 : index
    %0 = vector.load %arg2[%c0, %c0_0, %c0_1] : memref<1x4x256xf32, #tpu.memory_space<vmem>>, vector<1x4x256xf32>
    %1 = vector.shape_cast %0 : vector<1x4x256xf32> to vector<4x256xf32>
    %cst = arith.constant dense<0xFF800000> : vector<4xf32>
    %2 = vector.multi_reduction <maximumf>, %1, %cst [1] : vector<4x256xf32> to vector<4xf32>
    %3 = vector.shape_cast %2 : vector<4xf32> to vector<4x1xf32>
    %cst_2 = arith.constant dense<0.000000e+00> : vector<4xf32>
    %4 = vector.multi_reduction <add>, %1, %cst_2 [1] : vector<4x256xf32> to vector<4xf32>
    %5 = vector.shape_cast %4 : vector<4xf32> to vector<4x1xf32>
    %c0_i32 = arith.constant 0 : i32
    %6 = arith.cmpi eq, %arg1, %c0_i32 : i32
    %7 = arith.extui %6 : i1 to i32
    %c0_i32_3 = arith.constant 0 : i32
    %8 = arith.cmpi ne, %7, %c0_i32_3 : i32
    scf.if %8 {
      %c0_6 = arith.constant 0 : index
      %c0_7 = arith.constant 0 : index
      %c0_8 = arith.constant 0 : index
      %12 = vector.load %arg3[%c0_6, %c0_7, %c0_8] : memref<1x4x1xf32, #tpu.memory_space<vmem>>, vector<1x4x1xf32>
      %13 = vector.shape_cast %12 : vector<1x4x1xf32> to vector<4x1xf32>
      %14 = vector.shape_cast %3 : vector<4x1xf32> to vector<1x4x1xf32>
      tpu.vector_store %arg3[%c0_6, %c0_7, %c0_8], %14 {strides = array<i32>} : memref<1x4x1xf32, #tpu.memory_space<vmem>>, vector<1x4x1xf32>,
      %c0_9 = arith.constant 0 : index
      %c0_10 = arith.constant 0 : index
      %c0_11 = arith.constant 0 : index
      %15 = vector.load %arg4[%c0_9, %c0_10, %c0_11] : memref<1x4x1xf32, #tpu.memory_space<vmem>>, vector<1x4x1xf32>
      %16 = vector.shape_cast %15 : vector<1x4x1xf32> to vector<4x1xf32>
      %17 = vector.shape_cast %5 : vector<4x1xf32> to vector<1x4x1xf32>
      tpu.vector_store %arg4[%c0_9, %c0_10, %c0_11], %17 {strides = array<i32>} : memref<1x4x1xf32, #tpu.memory_space<vmem>>, vector<1x4x1xf32>,
    } else {
    }
    %c0_i32_4 = arith.constant 0 : i32
    %9 = arith.cmpi sgt, %arg1, %c0_i32_4 : i32
    %10 = arith.extui %9 : i1 to i32
    %c0_i32_5 = arith.constant 0 : i32
    %11 = arith.cmpi ne, %10, %c0_i32_5 : i32
    scf.if %11 {
      %c0_6 = arith.constant 0 : index
      %c0_7 = arith.constant 0 : index
      %c0_8 = arith.constant 0 : index
      %12 = vector.load %arg3[%c0_6, %c0_7, %c0_8] : memref<1x4x1xf32, #tpu.memory_space<vmem>>, vector<1x4x1xf32>
      %13 = vector.shape_cast %12 : vector<1x4x1xf32> to vector<4x1xf32>
      %14 = arith.maximumf %13, %3 : vector<4x1xf32>
      %c0_9 = arith.constant 0 : index
      %c0_10 = arith.constant 0 : index
      %c0_11 = arith.constant 0 : index
      %15 = vector.load %arg3[%c0_9, %c0_10, %c0_11] : memref<1x4x1xf32, #tpu.memory_space<vmem>>, vector<1x4x1xf32>
      %16 = vector.shape_cast %15 : vector<1x4x1xf32> to vector<4x1xf32>
      %17 = vector.shape_cast %14 : vector<4x1xf32> to vector<1x4x1xf32>
      tpu.vector_store %arg3[%c0_9, %c0_10, %c0_11], %17 {strides = array<i32>} : memref<1x4x1xf32, #tpu.memory_space<vmem>>, vector<1x4x1xf32>,
      %c0_12 = arith.constant 0 : index
      %c0_13 = arith.constant 0 : index
      %c0_14 = arith.constant 0 : index
      %18 = vector.load %arg4[%c0_12, %c0_13, %c0_14] : memref<1x4x1xf32, #tpu.memory_space<vmem>>, vector<1x4x1xf32>
      %19 = vector.shape_cast %18 : vector<1x4x1xf32> to vector<4x1xf32>
      %20 = arith.addf %19, %5 : vector<4x1xf32>
      %c0_15 = arith.constant 0 : index
      %c0_16 = arith.constant 0 : index
      %c0_17 = arith.constant 0 : index
      %21 = vector.load %arg4[%c0_15, %c0_16, %c0_17] : memref<1x4x1xf32, #tpu.memory_space<vmem>>, vector<1x4x1xf32>
      %22 = vector.shape_cast %21 : vector<1x4x1xf32> to vector<4x1xf32>
      %23 = vector.shape_cast %20 : vector<4x1xf32> to vector<1x4x1xf32>
      tpu.vector_store %arg4[%c0_15, %c0_16, %c0_17], %23 {strides = array<i32>} : memref<1x4x1xf32, #tpu.memory_space<vmem>>, vector<1x4x1xf32>,
    } else {
    }
    return
  }
  func.func @transform_0(%arg0: i32, %arg1: i32) -> (i32, i32, i32) {
    %c0_i32 = arith.constant 0 : i32
    %c0_i32_0 = arith.constant 0 : i32
    return %arg0, %c0_i32, %arg1 : i32, i32, i32
  }
  func.func @transform_1(%arg0: i32, %arg1: i32) -> (i32, i32, i32) {
    %c0_i32 = arith.constant 0 : i32
    %c0_i32_0 = arith.constant 0 : i32
    %c0_i32_1 = arith.constant 0 : i32
    return %arg0, %c0_i32, %c0_i32_0 : i32, i32, i32
  }
  func.func @transform_2(%arg0: i32, %arg1: i32) -> (i32, i32, i32) {
    %c0_i32 = arith.constant 0 : i32
    %c0_i32_0 = arith.constant 0 : i32
    %c0_i32_1 = arith.constant 0 : i32
    return %arg0, %c0_i32, %c0_i32_0 : i32, i32, i32
  }
}

</mosaic_0001>

<bundles_post_ra>
// kernel: tpu_custom_call.1
= control target key start
LH: loop header
LB: loop body
LE: loop exit
PB: predicated region body
PF: predicated region fallthrough
CT: control target
= control target key end

     0   :  { %8 = vsyncpa [#allocation3], 0  ;;  %s597_s0 = inlined_call_operand.hbm [shape: f32[2,4,256], index: 0, kind: input, shape index: {}]   ;;  %s598_s1 = inlined_call_operand.vmem [shape: f32[2,4,1], index: 1, kind: output, shape index: {0}]   ;;  %s599_s2 = inlined_call_operand.vmem [shape: f32[2,4,1], index: 2, kind: output, shape index: {1}]  }
   0x1   :  { %10 = vsyncpa [#allocation3 + $0x1], 0  ;;  %s494_s9 = smov 0   ;;  %s496_s10 = smov 0  }
   0x2   :  { %s498_s11 = smov 0   ;;  %s500_s12 = smov 0  }
   0x3   :  { %s502_s13 = smov 0   ;;  %s504_s14 = smov 0  }
   0x4 LB: > { %s328_s15 = sadd.s32 4294967295, %s476_s14   ;;  %s28_s16 = sadd.s32 1, %s472_s13  ;;  %s476_s14 = sphi %s504_s14, %s16_s14   ;;  %s472_s13 = sphi %s502_s13, %s607_s13   ;;  %s468_s12 = sphi %s500_s12, %s606_s12   ;;  %s464_s11 = sphi %s498_s11, %s605_s11   ;;  %s460_s10 = sphi %s496_s10, %s604_s10   ;;  %s456_s9 = sphi %s494_s9, %s603_s9  }
   0x5   : > { %p30_p0 = scmp.ge.s32.totalorder %s28_s16, 2  ;;  %s37_s17 = sadd.s32 1, %s464_s11 }
   0x6   : > { %p44_p1 = scmp.ne.s32.totalorder %s464_s11, %s460_s10  ;;  %p45_p2 = scmp.eq.s32.totalorder %s476_s14, 0 }
   0x7   : > { %s609_s16 = smov (%p30_p0, %s28_s16), 0  ;;  %p50_p4 = scmp.ne.s32.totalorder %s460_s10, %s456_s9 }
   0x8   : > { %p530_p3 = por %p45_p2, %p44_p1  ;;  %s32_s19 = ssub.s32 %s472_s13, %s609_s16 }
   0x9   : > { %p51_p5 = scmp.eq.s32.totalorder %s328_s15, 0  ;;  %p35_p6 = scmp.eq.s32.totalorder %s32_s19, 0 }
   0xa   : > { %p348_p8 = scmp.lt.s32.totalorder %s476_s14, 2  ;;  %s126_s22 = sand.u32 1, %s464_s11  }
   0xb   : > { %p537_p7 = por %p51_p5, %p50_p4  ;;  %s341_s23 = sshll.u32 %s472_s13, 7 }
   0xc   : > { %s543_s21 = scalar_select %p35_p6, %s464_s11, %s37_s17  }
   0xd   : > { %s332_s24 = sshll.u32 %s126_s22, 3  ;;  %s138_s27 = scalar_lea.hbm %s597_s0, %s341_s23 }
   0xe   : > { %s130_s28 = scalar_lea.vmem [#allocation2], %s332_s24  ;;  %p552_p9 = pnand %p348_p8, %p530_p3 }
   0xf   : > { %s140_s29 = sshll.u32 %s130_s28, 4  ;;  %p335_p10 = scmp.ge.s32.totalorder %s476_s14, 1  ;;  %s141_s29 = int_to_ptr.vmem [resolvable:$true] %s140_s29 }
  0x10   : > { %p145_p11 = scmp.lt.s32.totalorder %s476_s14, 3  ;;  %s127_s3 = scalar_lea.sflag [#allocation3], %s126_s22 }
  0x11   : > { %p400_p12 = pneg %p552_p9  ;;  %s411_s4 = scalar_lea.vmem %s141_s29, 128 }
  0x12   : > { %p412_p13 = scmp.ne.s32.totalorder %s141_s29, %s411_s4  ;;  %s478_s5 = smov [#allocation2]  }
  0x13   : > { %s416_s6 = sshll.u32 %s478_s5, 4  ;;  %s417_s6 = int_to_ptr.vmem [resolvable:$false] %s416_s6 }
  0x14   : > { %p414_p0 = pnand %p412_p13, %p400_p12  ;;  %s418_s7 = scalar_lea.vmem %s417_s6, 256 }
  0x15   : > { %p419_p2 = scmp.lt.s32.totalorder %s141_s29, %s417_s6  ;;  %p420_p3 = scmp.lt.s32.totalorder %s418_s7, %s411_s4 }
  0x16   : > { %p415_p1 = pneg %p414_p0 }
  0x17   : > { %p421_p4 = por %p420_p3, %p419_p2 }
  0x19   : > { %p422_p5 = pnand %p421_p4, %p415_p1 }
  0x1b   : > { %425 = shalt.err (!%p422_p5)
}
  0x1c   : > { %347 = dma.hbm_to_vmem [thread:$0]  (!%p552_p9), %s138_s27, 128, %s141_s29, %s127_s3  }
  0x1d   : > { %p146_p6 = pnand %p335_p10, %p145_p11 }
  0x1e   : > { %s151_s8 = sand.u32 (!%p146_p6), 1, %s460_s10  }
  0x1f   : > { %149 = sbr.rel (%p146_p6) target bundleno = 186 (0xba), region = 24  ;;  %s336_s9 = sshll.u32 (!%p146_p6), %s151_s8, 3 }
  0x20   : > { %s152_s15 = scalar_lea.sflag (!%p146_p6), [#allocation3], %s151_s8  ;;  %s155_s17 = scalar_lea.vmem (!%p146_p6), [#allocation2], %s336_s9 }
  0x24   : > { %451 = dma.done.wait (%p537_p7), %s152_s15, 128  }
  0x25   : > { %453 = vsyncadd (%p537_p7), %s152_s15, 4294967168  ;;  %vm192_vm0 = vcmask 1043456   ;;  %v188_v0 = vld [vmem:[%s155_s17] sm:$0xff]  ;;  %p180_p8 = scmp.lt.s32.totalorder %s468_s12, 1  ;;  %vm207_vm1 = vcmask 3072  }
  0x26   : > { %v190_v1 = vcombine.high %v188_v0, %v188_v0  ;;  %v193_v2 = vsel %vm192_vm0, %v188_v0, -inf  ;;  %v198_v4 = vsel %vm192_vm0, %v188_v0, 0.0 }
  0x27   : > { %s611_s12 = smov (!%p180_p8, %s468_s12), 1 }
  0x28   : > { %v194_v3 = vsel %vm192_vm0, %v190_v1, -inf  ;;  %v199_v5 = vsel %vm192_vm0, %v190_v1, 0.0  ;;  %s337_s18 = sshll.u32 %s611_s12, 2 }
  0x29   : > { %v195_v6 = vmax.f32 %v193_v2, %v194_v3  ;;  %v200_v7 = vadd.f32 %v199_v5, %v198_v4  ;;  %s183_s20 = scalar_lea.vmem %s598_s1, %s337_s18  ;;  %s187_s25 = scalar_lea.vmem %s599_s2, %s337_s18 }
  0x2b   : > { %196 = vmax.xlane.f32.xlu0 %v195_v6 }
  0x2f   : > { %201 = vadd.xlane.f32.xlu0 %v200_v7 }
  0xb4   : > { %v197_v8 = vpop.xlane.xlu0 %196 }
  0xb5   : > { %208 = vst.msk [vmem:[%s183_s20] sm:$0xf] %vm207_vm1, %v197_v8 }
  0xb8   : > { %v202_v9 = vpop.xlane.xlu0 %201 }
  0xb9   : > { %209 = vst.msk [vmem:[%s187_s25] sm:$0xf] %vm207_vm1, %v202_v9 }
  0xba PF: > { %s16_s14 = sadd.s32 1, %s476_s14   ;;  %s603_s9 = smov %s460_s10 }
  0xbb   : > { %p13_p7 = scmp.ge.s32.totalorder %s16_s14, 4   ;;  %s604_s10 = smov %s464_s11 }
  0xbc   : > { %s605_s11 = smov %s543_s21  ;;  %s606_s12 = smov %s472_s13 }
  0xbd   : > { %s607_s13 = smov %s609_s16  ;;  %15 = sbr.rel (!%p13_p7) target bundleno = 4 (0x4), region = 84 }
  0xc2   :  { %254 = vsyncpa [#allocation3], 1 }
  0xc3   :  { %256 = vsyncpa [#allocation3 + $0x1], 1 }

</bundles_post_ra>
